<compile_context>
chip_gen: v7x
topology: tpu7x:2x2x1
jax: 0.10.0
libtpu: 0.0.40
codegen_flags: <defaults>
</compile_context>

<pallas_src>
import functools

import jax
import jax.numpy as jnp
import numpy as np
from jax import lax
from jax.experimental import pallas as pl
from jax.experimental.pallas import tpu as pltpu


# --------------------------------------------------------------------------- #
# Pallas kernel
# --------------------------------------------------------------------------- #
def _focal_kernel(cls_ref, reg_ref, anc_ref, ann_m5_ref, ann_5m_ref, out_ref,
                  *, iou_threshold, a_valid, a_padded):
    s = pl.program_id(1)             # A-split index ("parallel", v7x core sharding)
    t = pl.program_id(2)             # A-tile index within split ("arbitrary" reduction)
    nt_inner = pl.num_programs(2)

    f32 = jnp.float32
    p = cls_ref[0].astype(f32)       # (C, TA)  classification probabilities (bf16 -> f32)
    reg = reg_ref[0].astype(f32)     # (4, TA)  regression predictions
    anc = anc_ref[0]                 # (4, TA)  raw anchors [x1, y1, x2, y2]
    ann_m5 = ann_m5_ref[0]           # (M, 5)   annotations (rows on sublanes)
    ann_5m = ann_5m_ref[0]           # (5, M)   annotations (for MXU gather)

    C, TA = p.shape
    M = ann_m5.shape[0]
    alpha = 0.25

    # ---- anchor geometry recomputed in-kernel (cheap lane-dense VPU ops) ----
    ax1 = anc[0:1, :]
    ay1 = anc[1:2, :]
    ax2 = anc[2:3, :]
    ay2 = anc[3:4, :]
    aw = ax2 - ax1
    ah = ay2 - ay1
    acx = ax1 + 0.5 * aw
    acy = ay1 + 0.5 * ah
    area_a = aw * ah

    # ---- annotation geometry (M, 1) columns ----
    bx1 = ann_m5[:, 0:1]
    by1 = ann_m5[:, 1:2]
    bx2 = ann_m5[:, 2:3]
    by2 = ann_m5[:, 3:4]
    valid_ann = ann_m5[:, 4:5] != -1.0        # padded annotation rows (class == -1)

    # ---- IoU matrix (M, TA): annotations on sublanes, anchors on lanes ----
    area_b = (bx2 - bx1) * (by2 - by1)                               # (M, 1)
    iw = jnp.maximum(jnp.minimum(ax2, bx2) - jnp.maximum(ax1, bx1), 0.0)
    ih = jnp.maximum(jnp.minimum(ay2, by2) - jnp.maximum(ay1, by1), 0.0)
    inter = iw * ih                                                  # (M, TA)
    ua = jnp.maximum(area_a + area_b - inter, 1e-8)
    # approx reciprocal (EUP) + one Newton step on the VPU -> near-f32-exact
    r = pl.reciprocal(ua, approx=True)
    r = r * (2.0 - ua * r)
    iou = jnp.where(valid_ann, inter * r, -1.0)

    # ---- max / argmax over annotations (sublane reduce, first-max tiebreak) ----
    iou_max = jnp.max(iou, axis=0, keepdims=True)                    # (1, TA)
    m_iota = lax.broadcasted_iota(jnp.int32, (M, TA), 0)
    argmax = jnp.min(jnp.where(iou == iou_max, m_iota, M),
                     axis=0, keepdims=True)                          # (1, TA)
    onehot = (m_iota == argmax).astype(f32)                          # (M, TA)

    # ---- gather assigned annotation via MXU: (5, M) @ (M, TA) -> (5, TA) ----
    g = jnp.dot(ann_5m, onehot, preferred_element_type=f32)
    gx1 = g[0:1, :]
    gy1 = g[1:2, :]
    gx2 = g[2:3, :]
    gy2 = g[3:4, :]
    gcls = g[4:5, :]

    # ---- target masks (fused; no materialized (C, TA) targets tensor) ----
    lt_mask = iou_max < iou_threshold                                # (1, TA)
    pos = iou_max >= (iou_threshold + 0.1)                           # (1, TA)
    if a_valid < a_padded:
        # mask anchors added by wrapper-side padding out of every reduction
        lane = lax.broadcasted_iota(jnp.int32, (1, TA), 1)
        gidx = (s * nt_inner + t) * TA + lane
        anchor_ok = gidx < a_valid
        pos = pos & anchor_ok
        keep = (lt_mask | pos) & anchor_ok
    else:
        keep = lt_mask | pos

    num_pos_t = jnp.sum(pos.astype(f32))

    # ---- focal classification loss (single-log BCE) ----
    class_iota = lax.broadcasted_iota(jnp.int32, (C, TA), 0).astype(f32)
    is_one = pos & (class_iota == gcls)                              # (C, TA)
    pc = jnp.clip(p, 1e-4, 1.0 - 1e-4)
    alpha_factor = jnp.where(is_one, alpha, 1.0 - alpha)
    fw = jnp.where(is_one, 1.0 - pc, pc)
    pt = jnp.where(is_one, pc, 1.0 - pc)
    bce = -jnp.log(pt)              # == -(t*log(p) + (1-t)*log(1-p)) for t in {0, 1}
    cls_loss = jnp.where(keep, alpha_factor * fw * fw * bce, 0.0)
    cls_sum_t = jnp.sum(cls_loss)

    # ---- smooth-L1 regression loss (positive anchors only) ----
    gw = gx2 - gx1
    gh = gy2 - gy1
    gcx = gx1 + 0.5 * gw
    gcy = gy1 + 0.5 * gh
    gw = jnp.maximum(gw, 1.0)
    gh = jnp.maximum(gh, 1.0)

    # exact (1, TA) divides kept for parity with the reference (negligible cost)
    tdx = ((gcx - acx) / aw) / 0.1
    tdy = ((gcy - acy) / ah) / 0.1
    tdw = jnp.log(gw / aw) / 0.2
    tdh = jnp.log(gh / ah) / 0.2

    def smooth_l1(tgt, pred):
        d = jnp.abs(tgt - pred)
        return jnp.where(d <= 1.0, 0.5 * d * d, d - 0.5)

    rl = (smooth_l1(tdx, reg[0:1, :]) + smooth_l1(tdy, reg[1:2, :]) +
          smooth_l1(tdw, reg[2:3, :]) + smooth_l1(tdh, reg[3:4, :]))   # (1, TA)
    reg_sum_t = jnp.sum(jnp.where(pos, rl, 0.0))

    # ---- accumulate partial sums directly in the resident output block ----
    # rows: 0 = cls_sum, 1 = reg_sum, 2 = num_pos (lane-dense (8,128) slab)
    row = lax.broadcasted_iota(jnp.int32, (8, 128), 0)
    partial = jnp.where(row == 0, cls_sum_t,
              jnp.where(row == 1, reg_sum_t,
              jnp.where(row == 2, num_pos_t, 0.0)))

    @pl.when(t == 0)
    def _():
        out_ref[0] = partial

    @pl.when(t != 0)
    def _():
        out_ref[0] = out_ref[0] + partial


# --------------------------------------------------------------------------- #
# Wrapper
# --------------------------------------------------------------------------- #
def _round_up(x, m):
    return ((x + m - 1) // m) * m


def focal_loss(classifications, regressions, anchors, annotations,
               iou_threshold=0.3, max_tile_a=1024, cls_dtype=jnp.bfloat16):
    """Pallas TPU forward pass of RetinaNet FocalLoss.

    classifications : (B, A, C) probabilities
    regressions     : (B, A, 4)
    anchors         : (1, A, 4)  [x1, y1, x2, y2]
    annotations     : (B, M, 5)  [x1, y1, x2, y2, class]; padded rows class = -1
    Returns (mean cls loss (1,), mean reg loss (1,), num_detected int32 scalar).
    """
    B, A, C = classifications.shape
    M = annotations.shape[1]
    f32 = jnp.float32

    # ---- tile sizing: 128-lane multiples, capped for VMEM spill (v7x: 64 MiB) ----
    tile_a = min(max(int(max_tile_a), 128), _round_up(A, 128))
    tile_a = _round_up(tile_a, 128)
    a_pad = _round_up(A, tile_a)
    nt = a_pad // tile_a
    # split the A-tile axis so both v7x TensorCores have work even when B == 1
    n_split = 2 if (nt >= 2 and nt % 2 == 0) else 1
    nt_inner = nt // n_split

    # ---- lane-dense layouts (A on lanes); bf16 cast BEFORE the transpose ----
    # TODO(synk): ideally the model emits classifications already as (B, C, A) so
    # this standalone transpose disappears entirely.
    cls_t = jnp.transpose(classifications.astype(cls_dtype), (0, 2, 1))   # (B, C, A)
    reg_t = jnp.transpose(regressions.astype(f32), (0, 2, 1))             # (B, 4, A)
    anc_t = jnp.transpose(anchors.astype(f32), (0, 2, 1))                 # (1, 4, A)
    ann = annotations.astype(f32)                                         # (B, M, 5)
    ann_t = jnp.transpose(ann, (0, 2, 1))                                 # (B, 5, M)

    # ---- pad anchor axis to a multiple of tile_a (masked again in-kernel) ----
    if a_pad != A:
        pad = a_pad - A
        cls_t = jnp.pad(cls_t, ((0, 0), (0, 0), (0, pad)))
        reg_t = jnp.pad(reg_t, ((0, 0), (0, 0), (0, pad)))
        pad_box = jnp.tile(jnp.array([0.0, 0.0, 1.0, 1.0], f32).reshape(1, 4, 1),
                           (1, 1, pad))     # degenerate 1x1 boxes: no zero divides
        anc_t = jnp.concatenate([anc_t, pad_box], axis=2)

    kernel = functools.partial(_focal_kernel,
                               iou_threshold=float(iou_threshold),
                               a_valid=A, a_padded=a_pad)

    out = pl.pallas_call(
        kernel,
        out_shape=jax.ShapeDtypeStruct((B * n_split, 8, 128), f32),
        grid=(B, n_split, nt_inner),
        in_specs=[
            pl.BlockSpec((1, C, tile_a), lambda b, s, t: (b, 0, s * nt_inner + t)),
            pl.BlockSpec((1, 4, tile_a), lambda b, s, t: (b, 0, s * nt_inner + t)),
            pl.BlockSpec((1, 4, tile_a), lambda b, s, t: (0, 0, s * nt_inner + t)),
            pl.BlockSpec((1, M, 5), lambda b, s, t: (b, 0, 0)),
            pl.BlockSpec((1, 5, M), lambda b, s, t: (b, 0, 0)),
        ],
        out_specs=pl.BlockSpec((1, 8, 128), lambda b, s, t: (b * n_split + s, 0, 0)),
        compiler_params=pltpu.CompilerParams(
            dimension_semantics=("parallel", "parallel", "arbitrary"),
            vmem_limit_bytes=32 * 1024 * 1024),
    )(cls_t, reg_t, anc_t, ann, ann_t)

    # ---- combine per-split partials and normalize (tiny, done in the wrapper) ----
    out = out.reshape(B, n_split, 8, 128)
    sums = jnp.sum(out[:, :, :3, 0], axis=1)                 # (B, 3)
    cls_sum, reg_sum, npos = sums[:, 0], sums[:, 1], sums[:, 2]
    cls_losses = cls_sum / jnp.maximum(npos, 1.0)
    reg_losses = jnp.where(npos > 0.0, reg_sum / jnp.maximum(npos * 4.0, 1.0), 0.0)
    return (jnp.mean(cls_losses, keepdims=True),
            jnp.mean(reg_losses, keepdims=True),
            jnp.sum(npos).astype(jnp.int32))


# --------------------------------------------------------------------------- #
# Pure-JAX reference (mirrors the PyTorch module) for validation
# --------------------------------------------------------------------------- #
def focal_loss_reference(classifications, regressions, anchors, annotations,
                         iou_threshold=0.3):
    f32 = jnp.float32
    cls = classifications.astype(f32)            # (B, A, C)
    reg = regressions.astype(f32)                # (B, A, 4)
    anchor = anchors.astype(f32)[0]              # (A, 4)
    ann = annotations.astype(f32)                # (B, M, 5)
    B, A, C = cls.shape

    aw = anchor[:, 2] - anchor[:, 0]
    ah = anchor[:, 3] - anchor[:, 1]
    acx = anchor[:, 0] + 0.5 * aw
    acy = anchor[:, 1] + 0.5 * ah
    pos_thresh = jnp.float32(iou_threshold + 0.1)

    cls_losses, reg_losses = [], []
    num_det = jnp.float32(0.0)
    for j in range(B):
        p = jnp.clip(cls[j], 1e-4, 1.0 - 1e-4)                     # (A, C)
        a = ann[j]                                                 # (M, 5)
        valid = a[:, 4] != -1.0
        area_b = (a[:, 2] - a[:, 0]) * (a[:, 3] - a[:, 1])
        iw = jnp.maximum(jnp.minimum(anchor[:, 2][:, None], a[:, 2][None, :]) -
                         jnp.maximum(anchor[:, 0][:, None], a[:, 0][None, :]), 0.0)
        ih = jnp.maximum(jnp.minimum(anchor[:, 3][:, None], a[:, 3][None, :]) -
                         jnp.maximum(anchor[:, 1][:, None], a[:, 1][None, :]), 0.0)
        inter = iw * ih
        ua = jnp.maximum((aw * ah)[:, None] + area_b[None, :] - inter, 1e-8)
        iou = jnp.where(valid[None, :], inter / ua, -1.0)          # (A, M)
        iou_max = jnp.max(iou, axis=1)
        assigned = a[jnp.argmax(iou, axis=1)]                      # (A, 5)

        lt = iou_max < iou_threshold
        pos = iou_max >= pos_thresh
        npos = jnp.sum(pos.astype(f32))
        num_det = num_det + npos

        class_ids = jnp.arange(C, dtype=f32)[None, :]
        is_one = pos[:, None] & (class_ids == assigned[:, 4:5])
        keep = (lt | pos)[:, None]
        af = jnp.where(is_one, 0.25, 0.75)
        fw = jnp.where(is_one, 1.0 - p, p)
        pt = jnp.where(is_one, p, 1.0 - p)
        cl = jnp.where(keep, af * fw * fw * (-jnp.log(pt)), 0.0)
        cls_losses.append(jnp.sum(cl) / jnp.maximum(npos, 1.0))

        gw0 = assigned[:, 2] - assigned[:, 0]
        gh0 = assigned[:, 3] - assigned[:, 1]
        gcx = assigned[:, 0] + 0.5 * gw0
        gcy = assigned[:, 1] + 0.5 * gh0
        gw = jnp.maximum(gw0, 1.0)
        gh = jnp.maximum(gh0, 1.0)
        tgt = jnp.stack([((gcx - acx) / aw) / 0.1,
                         ((gcy - acy) / ah) / 0.1,
                         jnp.log(gw / aw) / 0.2,
                         jnp.log(gh / ah) / 0.2], axis=1)          # (A, 4)
        d = jnp.abs(tgt - reg[j])
        rl = jnp.sum(jnp.where(d <= 1.0, 0.5 * d * d, d - 0.5), axis=1)
        rsum = jnp.sum(jnp.where(pos, rl, 0.0))
        reg_losses.append(jnp.where(npos > 0.0,
                                    rsum / jnp.maximum(npos * 4.0, 1.0), 0.0))

    return (jnp.mean(jnp.stack(cls_losses), keepdims=True),
            jnp.mean(jnp.stack(reg_losses), keepdims=True),
            num_det.astype(jnp.int32))


# --------------------------------------------------------------------------- #
# Demo / self-check
# --------------------------------------------------------------------------- #
if __name__ == "__main__":
    key = jax.random.PRNGKey(0)
    B, C, M = 2, 4, 8

    # 512 deterministic anchors: 16x16 grid (stride 8) x 2 scales over a 128px image
    xs = jnp.arange(16, dtype=jnp.float32) * 8.0
    gx, gy = jnp.meshgrid(xs, xs, indexing="ij")
    x1 = jnp.concatenate([gx.reshape(-1), gx.reshape(-1)])
    y1 = jnp.concatenate([gy.reshape(-1), gy.reshape(-1)])
    wh = jnp.concatenate([jnp.full((256,), 8.0), jnp.full((256,), 12.0)])
    anchors_all = jnp.stack([x1, y1, x1 + wh, y1 + wh], axis=1)[None]   # (1, 512, 4)
    A_full = anchors_all.shape[1]

    k1, k2 = jax.random.split(key)
    cls_all = jax.nn.sigmoid(jax.random.normal(k1, (B, A_full, C), dtype=jnp.float32))
    reg_all = 0.1 * jax.random.normal(k2, (B, A_full, 4), dtype=jnp.float32)

    # annotations (B, M, 5): [x1, y1, x2, y2, class]; padded rows have class = -1
    annotations = jnp.full((B, M, 5), -1.0, dtype=jnp.float32)
    annotations = annotations.at[0, 0].set(jnp.array([16., 16., 24., 24., 1.]))
    annotations = annotations.at[0, 1].set(jnp.array([40.,  8., 52., 20., 3.]))
    annotations = annotations.at[1, 0].set(jnp.array([ 0.,  0., 10., 10., 0.]))
    annotations = annotations.at[1, 1].set(jnp.array([32., 32., 44., 44., 2.]))
    annotations = annotations.at[1, 2].set(jnp.array([ 8., 48., 20., 60., 1.]))

    def run_and_check(a_test, max_tile_a):
        cls = cls_all[:, :a_test]
        reg = reg_all[:, :a_test]
        anc = anchors_all[:, :a_test]
        got = jax.block_until_ready(
            focal_loss(cls, reg, anc, annotations, max_tile_a=max_tile_a))
        # reference sees the same bf16-quantized classifications as the kernel
        cls_q = cls.astype(jnp.bfloat16).astype(jnp.float32)
        want = jax.block_until_ready(
            focal_loss_reference(cls_q, reg, anc, annotations))
        np.testing.assert_allclose(np.asarray(got[0]), np.asarray(want[0]),
                                   rtol=2e-3, atol=1e-3)
        np.testing.assert_allclose(np.asarray(got[1]), np.asarray(want[1]),
                                   rtol=2e-3, atol=1e-3)
        assert int(got[2]) == int(want[2]), (int(got[2]), int(want[2]))
        return got

    # multi-tile reduction + 2-way split-parallel A axis (accumulator path)
    run_and_check(A_full, max_tile_a=128)
    # A not a multiple of 128 -> wrapper pads, kernel masks padded anchors
    run_and_check(456, max_tile_a=128)

    print("KERNEL_OK")
</pallas_src>

<mosaic_0001>
module attributes {stable_mosaic.version = 11 : i64} {
  func.func @_focal_kernel(%arg0: i32, %arg1: i32, %arg2: i32, %arg3: memref<1x4x128xbf16, #tpu.memory_space<vmem>>, %arg4: memref<1x4x128xf32, #tpu.memory_space<vmem>>, %arg5: memref<1x4x128xf32, #tpu.memory_space<vmem>>, %arg6: memref<1x8x5xf32, #tpu.memory_space<vmem>>, %arg7: memref<1x5x8xf32, #tpu.memory_space<vmem>>, %arg8: memref<1x8x128xf32, #tpu.memory_space<vmem>>) attributes {dimension_semantics = [#tpu.dimension_semantics<parallel>, #tpu.dimension_semantics<parallel>, #tpu.dimension_semantics<arbitrary>], iteration_bounds = array<i64: 2, 2, 2>, scalar_prefetch = 0 : i64, scratch_operands = 0 : i64, tpu.core_type = #tpu.core_type<tc>, window_params = [{transform_indices = @transform_0, window_bounds = array<i64: 1, 4, 128>}, {transform_indices = @transform_1, window_bounds = array<i64: 1, 4, 128>}, {transform_indices = @transform_2, window_bounds = array<i64: 1, 4, 128>}, {transform_indices = @transform_3, window_bounds = array<i64: 1, 8, 5>}, {transform_indices = @transform_4, window_bounds = array<i64: 1, 5, 8>}, {transform_indices = @transform_5, window_bounds = array<i64: 1, 8, 128>}]} {
    %c0 = arith.constant 0 : index
    %c0_0 = arith.constant 0 : index
    %c0_1 = arith.constant 0 : index
    %0 = vector.load %arg3[%c0, %c0_0, %c0_1] : memref<1x4x128xbf16, #tpu.memory_space<vmem>>, vector<1x4x128xbf16>
    %1 = vector.shape_cast %0 : vector<1x4x128xbf16> to vector<4x128xbf16>
    %2 = arith.extf %1 : vector<4x128xbf16> to vector<4x128xf32>
    %c0_2 = arith.constant 0 : index
    %c0_3 = arith.constant 0 : index
    %c0_4 = arith.constant 0 : index
    %3 = vector.load %arg4[%c0_2, %c0_3, %c0_4] : memref<1x4x128xf32, #tpu.memory_space<vmem>>, vector<1x4x128xf32>
    %4 = vector.shape_cast %3 : vector<1x4x128xf32> to vector<4x128xf32>
    %c0_5 = arith.constant 0 : index
    %c0_6 = arith.constant 0 : index
    %c0_7 = arith.constant 0 : index
    %5 = vector.load %arg5[%c0_5, %c0_6, %c0_7] : memref<1x4x128xf32, #tpu.memory_space<vmem>>, vector<1x4x128xf32>
    %6 = vector.shape_cast %5 : vector<1x4x128xf32> to vector<4x128xf32>
    %c0_8 = arith.constant 0 : index
    %c0_9 = arith.constant 0 : index
    %c0_10 = arith.constant 0 : index
    %7 = vector.load %arg6[%c0_8, %c0_9, %c0_10] : memref<1x8x5xf32, #tpu.memory_space<vmem>>, vector<1x8x5xf32>
    %8 = vector.shape_cast %7 : vector<1x8x5xf32> to vector<8x5xf32>
    %c0_11 = arith.constant 0 : index
    %c0_12 = arith.constant 0 : index
    %c0_13 = arith.constant 0 : index
    %9 = vector.load %arg7[%c0_11, %c0_12, %c0_13] : memref<1x5x8xf32, #tpu.memory_space<vmem>>, vector<1x5x8xf32>
    %10 = vector.shape_cast %9 : vector<1x5x8xf32> to vector<5x8xf32>
    %11 = vector.extract_strided_slice %6 {offsets = [0, 0], sizes = [1, 128], strides = [1, 1]} : vector<4x128xf32> to vector<1x128xf32>
    %12 = vector.extract_strided_slice %6 {offsets = [1, 0], sizes = [1, 128], strides = [1, 1]} : vector<4x128xf32> to vector<1x128xf32>
    %13 = vector.extract_strided_slice %6 {offsets = [2, 0], sizes = [1, 128], strides = [1, 1]} : vector<4x128xf32> to vector<1x128xf32>
    %14 = vector.extract_strided_slice %6 {offsets = [3, 0], sizes = [1, 128], strides = [1, 1]} : vector<4x128xf32> to vector<1x128xf32>
    %15 = arith.subf %13, %11 : vector<1x128xf32>
    %16 = arith.subf %14, %12 : vector<1x128xf32>
    %cst = arith.constant 5.000000e-01 : f32
    %17 = vector.broadcast %cst : f32 to vector<1x128xf32>
    %18 = arith.mulf %17, %15 : vector<1x128xf32>
    %19 = arith.addf %11, %18 : vector<1x128xf32>
    %cst_14 = arith.constant 5.000000e-01 : f32
    %20 = vector.broadcast %cst_14 : f32 to vector<1x128xf32>
    %21 = arith.mulf %20, %16 : vector<1x128xf32>
    %22 = arith.addf %12, %21 : vector<1x128xf32>
    %23 = arith.mulf %15, %16 : vector<1x128xf32>
    %24 = vector.extract_strided_slice %8 {offsets = [0, 0], sizes = [8, 1], strides = [1, 1]} : vector<8x5xf32> to vector<8x1xf32>
    %25 = vector.extract_strided_slice %8 {offsets = [0, 1], sizes = [8, 1], strides = [1, 1]} : vector<8x5xf32> to vector<8x1xf32>
    %26 = vector.extract_strided_slice %8 {offsets = [0, 2], sizes = [8, 1], strides = [1, 1]} : vector<8x5xf32> to vector<8x1xf32>
    %27 = vector.extract_strided_slice %8 {offsets = [0, 3], sizes = [8, 1], strides = [1, 1]} : vector<8x5xf32> to vector<8x1xf32>
    %28 = vector.extract_strided_slice %8 {offsets = [0, 4], sizes = [8, 1], strides = [1, 1]} : vector<8x5xf32> to vector<8x1xf32>
    %cst_15 = arith.constant -1.000000e+00 : f32
    %29 = vector.broadcast %cst_15 : f32 to vector<8x1xf32>
    %30 = arith.cmpf one, %28, %29 : vector<8x1xf32>
    %31 = arith.subf %26, %24 : vector<8x1xf32>
    %32 = arith.subf %27, %25 : vector<8x1xf32>
    %33 = arith.mulf %31, %32 : vector<8x1xf32>
    %34 = vector.broadcast %13 : vector<1x128xf32> to vector<8x128xf32>
    %35 = vector.broadcast %26 : vector<8x1xf32> to vector<8x128xf32>
    %36 = arith.minimumf %34, %35 : vector<8x128xf32>
    %37 = vector.broadcast %11 : vector<1x128xf32> to vector<8x128xf32>
    %38 = vector.broadcast %24 : vector<8x1xf32> to vector<8x128xf32>
    %39 = arith.maximumf %37, %38 : vector<8x128xf32>
    %40 = arith.subf %36, %39 : vector<8x128xf32>
    %cst_16 = arith.constant 0.000000e+00 : f32
    %41 = vector.broadcast %cst_16 : f32 to vector<8x128xf32>
    %42 = arith.maximumf %40, %41 : vector<8x128xf32>
    %43 = vector.broadcast %14 : vector<1x128xf32> to vector<8x128xf32>
    %44 = vector.broadcast %27 : vector<8x1xf32> to vector<8x128xf32>
    %45 = arith.minimumf %43, %44 : vector<8x128xf32>
    %46 = vector.broadcast %12 : vector<1x128xf32> to vector<8x128xf32>
    %47 = vector.broadcast %25 : vector<8x1xf32> to vector<8x128xf32>
    %48 = arith.maximumf %46, %47 : vector<8x128xf32>
    %49 = arith.subf %45, %48 : vector<8x128xf32>
    %cst_17 = arith.constant 0.000000e+00 : f32
    %50 = vector.broadcast %cst_17 : f32 to vector<8x128xf32>
    %51 = arith.maximumf %49, %50 : vector<8x128xf32>
    %52 = arith.mulf %42, %51 : vector<8x128xf32>
    %53 = vector.broadcast %23 : vector<1x128xf32> to vector<8x128xf32>
    %54 = vector.broadcast %33 : vector<8x1xf32> to vector<8x128xf32>
    %55 = arith.addf %53, %54 : vector<8x128xf32>
    %56 = arith.subf %55, %52 : vector<8x128xf32>
    %cst_18 = arith.constant 9.99999993E-9 : f32
    %57 = vector.broadcast %cst_18 : f32 to vector<8x128xf32>
    %58 = arith.maximumf %56, %57 : vector<8x128xf32>
    %59 = tpu.reciprocal %58 {approx = true} : vector<8x128xf32> -> vector<8x128xf32>
    %60 = arith.mulf %58, %59 : vector<8x128xf32>
    %cst_19 = arith.constant 2.000000e+00 : f32
    %61 = vector.broadcast %cst_19 : f32 to vector<8x128xf32>
    %62 = arith.subf %61, %60 : vector<8x128xf32>
    %63 = arith.mulf %59, %62 : vector<8x128xf32>
    %64 = arith.mulf %52, %63 : vector<8x128xf32>
    %cst_20 = arith.constant -1.000000e+00 : f32
    %65 = vector.shape_cast %30 : vector<8x1xi1> to vector<8x1xi1>
    %66 = vector.broadcast %65 : vector<8x1xi1> to vector<8x128xi1>
    %67 = vector.broadcast %cst_20 : f32 to vector<8x128xf32>
    %68 = arith.select %66, %64, %67 : vector<8x128xi1>, vector<8x128xf32>
    %cst_21 = arith.constant dense<0xFF800000> : vector<128xf32>
    %69 = vector.multi_reduction <maximumf>, %68, %cst_21 [0] : vector<8x128xf32> to vector<128xf32>
    %70 = vector.shape_cast %69 : vector<128xf32> to vector<1x128xf32>
    %71 = tpu.iota {dimensions = array<i32: 0>} : vector<8x128xi32>
    %72 = vector.broadcast %70 : vector<1x128xf32> to vector<8x128xf32>
    %73 = arith.cmpf oeq, %68, %72 : vector<8x128xf32>
    %c8_i32 = arith.constant 8 : i32
    %74 = vector.broadcast %c8_i32 : i32 to vector<8x128xi32>
    %75 = arith.select %73, %71, %74 : vector<8x128xi1>, vector<8x128xi32>
    %cst_22 = arith.constant dense<2147483647> : vector<128xi32>
    %76 = vector.multi_reduction <minsi>, %75, %cst_22 [0] : vector<8x128xi32> to vector<128xi32>
    %77 = vector.shape_cast %76 : vector<128xi32> to vector<1x128xi32>
    %78 = vector.broadcast %77 : vector<1x128xi32> to vector<8x128xi32>
    %79 = arith.cmpi eq, %71, %78 : vector<8x128xi32>
    %80 = arith.extui %79 : vector<8x128xi1> to vector<8x128xi32>
    %81 = arith.sitofp %80 : vector<8x128xi32> to vector<8x128xf32>
    %cst_23 = arith.constant dense<0.000000e+00> : vector<5x128xf32>
    %82 = tpu.matmul %10, %81, %cst_23 {dimension_numbers = #tpu.dot_dimension_numbers<[1], [0], [0], [1], [0, 0, 1, 1], [], []>} : vector<5x8xf32>, vector<8x128xf32>, vector<5x128xf32> -> vector<5x128xf32>
    %83 = vector.extract_strided_slice %82 {offsets = [0, 0], sizes = [1, 128], strides = [1, 1]} : vector<5x128xf32> to vector<1x128xf32>
    %84 = vector.extract_strided_slice %82 {offsets = [1, 0], sizes = [1, 128], strides = [1, 1]} : vector<5x128xf32> to vector<1x128xf32>
    %85 = vector.extract_strided_slice %82 {offsets = [2, 0], sizes = [1, 128], strides = [1, 1]} : vector<5x128xf32> to vector<1x128xf32>
    %86 = vector.extract_strided_slice %82 {offsets = [3, 0], sizes = [1, 128], strides = [1, 1]} : vector<5x128xf32> to vector<1x128xf32>
    %87 = vector.extract_strided_slice %82 {offsets = [4, 0], sizes = [1, 128], strides = [1, 1]} : vector<5x128xf32> to vector<1x128xf32>
    %cst_24 = arith.constant 3.000000e-01 : f32
    %88 = vector.broadcast %cst_24 : f32 to vector<1x128xf32>
    %89 = arith.cmpf olt, %70, %88 : vector<1x128xf32>
    %cst_25 = arith.constant 4.000000e-01 : f32
    %90 = vector.broadcast %cst_25 : f32 to vector<1x128xf32>
    %91 = arith.cmpf oge, %70, %90 : vector<1x128xf32>
    %92 = arith.ori %89, %91 : vector<1x128xi1>
    %93 = arith.extui %91 : vector<1x128xi1> to vector<1x128xi32>
    %94 = arith.sitofp %93 : vector<1x128xi32> to vector<1x128xf32>
    %95 = vector.shape_cast %94 : vector<1x128xf32> to vector<1x1x128xf32>
    %cst_26 = arith.constant dense<0.000000e+00> : vector<1xf32>
    %96 = vector.multi_reduction <add>, %95, %cst_26 [1, 2] : vector<1x1x128xf32> to vector<1xf32>
    %97 = vector.shape_cast %96 : vector<1xf32> to vector<1x1x1xf32>
    %98 = vector.extract %97[0, 0, 0] : f32 from vector<1x1x1xf32>
    %99 = tpu.iota {dimensions = array<i32: 0>} : vector<4x128xi32>
    %100 = arith.sitofp %99 : vector<4x128xi32> to vector<4x128xf32>
    %101 = vector.broadcast %87 : vector<1x128xf32> to vector<4x128xf32>
    %102 = arith.cmpf oeq, %100, %101 : vector<4x128xf32>
    %103 = vector.broadcast %91 : vector<1x128xi1> to vector<4x128xi1>
    %104 = arith.andi %103, %102 : vector<4x128xi1>
    %cst_27 = arith.constant 9.99999974E-5 : f32
    %cst_28 = arith.constant 0.999899983 : f32
    %105 = vector.broadcast %cst_27 : f32 to vector<4x128xf32>
    %106 = arith.maximumf %105, %2 : vector<4x128xf32>
    %107 = vector.broadcast %cst_28 : f32 to vector<4x128xf32>
    %108 = arith.minimumf %107, %106 : vector<4x128xf32>
    %cst_29 = arith.constant 2.500000e-01 : f32
    %cst_30 = arith.constant 7.500000e-01 : f32
    %109 = vector.broadcast %cst_29 : f32 to vector<4x128xf32>
    %110 = vector.broadcast %cst_30 : f32 to vector<4x128xf32>
    %111 = arith.select %104, %109, %110 : vector<4x128xi1>, vector<4x128xf32>
    %cst_31 = arith.constant 1.000000e+00 : f32
    %112 = vector.broadcast %cst_31 : f32 to vector<4x128xf32>
    %113 = arith.subf %112, %108 : vector<4x128xf32>
    %114 = arith.select %104, %113, %108 : vector<4x128xi1>, vector<4x128xf32>
    %cst_32 = arith.constant 1.000000e+00 : f32
    %115 = vector.broadcast %cst_32 : f32 to vector<4x128xf32>
    %116 = arith.subf %115, %108 : vector<4x128xf32>
    %117 = arith.select %104, %108, %116 : vector<4x128xi1>, vector<4x128xf32>
    %118 = math.log %117 : vector<4x128xf32>
    %cst_33 = arith.constant 0.000000e+00 : f32
    %119 = vector.broadcast %cst_33 : f32 to vector<4x128xf32>
    %120 = arith.subf %119, %118 : vector<4x128xf32>
    %121 = arith.mulf %111, %114 : vector<4x128xf32>
    %122 = arith.mulf %121, %114 : vector<4x128xf32>
    %123 = arith.mulf %122, %120 : vector<4x128xf32>
    %cst_34 = arith.constant 0.000000e+00 : f32
    %124 = vector.shape_cast %92 : vector<1x128xi1> to vector<1x128xi1>
    %125 = vector.broadcast %124 : vector<1x128xi1> to vector<4x128xi1>
    %126 = vector.broadcast %cst_34 : f32 to vector<4x128xf32>
    %127 = arith.select %125, %123, %126 : vector<4x128xi1>, vector<4x128xf32>
    %128 = vector.shape_cast %127 : vector<4x128xf32> to vector<1x4x128xf32>
    %cst_35 = arith.constant dense<0.000000e+00> : vector<1xf32>
    %129 = vector.multi_reduction <add>, %128, %cst_35 [1, 2] : vector<1x4x128xf32> to vector<1xf32>
    %130 = vector.shape_cast %129 : vector<1xf32> to vector<1x1x1xf32>
    %131 = vector.extract %130[0, 0, 0] : f32 from vector<1x1x1xf32>
    %132 = arith.subf %85, %83 : vector<1x128xf32>
    %133 = arith.subf %86, %84 : vector<1x128xf32>
    %cst_36 = arith.constant 5.000000e-01 : f32
    %134 = vector.broadcast %cst_36 : f32 to vector<1x128xf32>
    %135 = arith.mulf %134, %132 : vector<1x128xf32>
    %136 = arith.addf %83, %135 : vector<1x128xf32>
    %cst_37 = arith.constant 5.000000e-01 : f32
    %137 = vector.broadcast %cst_37 : f32 to vector<1x128xf32>
    %138 = arith.mulf %137, %133 : vector<1x128xf32>
    %139 = arith.addf %84, %138 : vector<1x128xf32>
    %cst_38 = arith.constant 1.000000e+00 : f32
    %140 = vector.broadcast %cst_38 : f32 to vector<1x128xf32>
    %141 = arith.maximumf %132, %140 : vector<1x128xf32>
    %cst_39 = arith.constant 1.000000e+00 : f32
    %142 = vector.broadcast %cst_39 : f32 to vector<1x128xf32>
    %143 = arith.maximumf %133, %142 : vector<1x128xf32>
    %144 = arith.subf %136, %19 : vector<1x128xf32>
    %145 = arith.divf %144, %15 : vector<1x128xf32>
    %cst_40 = arith.constant 1.000000e-01 : f32
    %146 = vector.broadcast %cst_40 : f32 to vector<1x128xf32>
    %147 = arith.divf %145, %146 : vector<1x128xf32>
    %148 = arith.subf %139, %22 : vector<1x128xf32>
    %149 = arith.divf %148, %16 : vector<1x128xf32>
    %cst_41 = arith.constant 1.000000e-01 : f32
    %150 = vector.broadcast %cst_41 : f32 to vector<1x128xf32>
    %151 = arith.divf %149, %150 : vector<1x128xf32>
    %152 = arith.divf %141, %15 : vector<1x128xf32>
    %153 = math.log %152 : vector<1x128xf32>
    %cst_42 = arith.constant 2.000000e-01 : f32
    %154 = vector.broadcast %cst_42 : f32 to vector<1x128xf32>
    %155 = arith.divf %153, %154 : vector<1x128xf32>
    %156 = arith.divf %143, %16 : vector<1x128xf32>
    %157 = math.log %156 : vector<1x128xf32>
    %cst_43 = arith.constant 2.000000e-01 : f32
    %158 = vector.broadcast %cst_43 : f32 to vector<1x128xf32>
    %159 = arith.divf %157, %158 : vector<1x128xf32>
    %160 = vector.extract_strided_slice %4 {offsets = [0, 0], sizes = [1, 128], strides = [1, 1]} : vector<4x128xf32> to vector<1x128xf32>
    %161 = arith.subf %147, %160 : vector<1x128xf32>
    %162 = math.absf %161 : vector<1x128xf32>
    %cst_44 = arith.constant 1.000000e+00 : f32
    %163 = vector.broadcast %cst_44 : f32 to vector<1x128xf32>
    %164 = arith.cmpf ole, %162, %163 : vector<1x128xf32>
    %cst_45 = arith.constant 5.000000e-01 : f32
    %165 = vector.broadcast %cst_45 : f32 to vector<1x128xf32>
    %166 = arith.mulf %165, %162 : vector<1x128xf32>
    %167 = arith.mulf %166, %162 : vector<1x128xf32>
    %cst_46 = arith.constant 5.000000e-01 : f32
    %168 = vector.broadcast %cst_46 : f32 to vector<1x128xf32>
    %169 = arith.subf %162, %168 : vector<1x128xf32>
    %170 = arith.select %164, %167, %169 : vector<1x128xi1>, vector<1x128xf32>
    %171 = vector.extract_strided_slice %4 {offsets = [1, 0], sizes = [1, 128], strides = [1, 1]} : vector<4x128xf32> to vector<1x128xf32>
    %172 = arith.subf %151, %171 : vector<1x128xf32>
    %173 = math.absf %172 : vector<1x128xf32>
    %cst_47 = arith.constant 1.000000e+00 : f32
    %174 = vector.broadcast %cst_47 : f32 to vector<1x128xf32>
    %175 = arith.cmpf ole, %173, %174 : vector<1x128xf32>
    %cst_48 = arith.constant 5.000000e-01 : f32
    %176 = vector.broadcast %cst_48 : f32 to vector<1x128xf32>
    %177 = arith.mulf %176, %173 : vector<1x128xf32>
    %178 = arith.mulf %177, %173 : vector<1x128xf32>
    %cst_49 = arith.constant 5.000000e-01 : f32
    %179 = vector.broadcast %cst_49 : f32 to vector<1x128xf32>
    %180 = arith.subf %173, %179 : vector<1x128xf32>
    %181 = arith.select %175, %178, %180 : vector<1x128xi1>, vector<1x128xf32>
    %182 = arith.addf %170, %181 : vector<1x128xf32>
    %183 = vector.extract_strided_slice %4 {offsets = [2, 0], sizes = [1, 128], strides = [1, 1]} : vector<4x128xf32> to vector<1x128xf32>
    %184 = arith.subf %155, %183 : vector<1x128xf32>
    %185 = math.absf %184 : vector<1x128xf32>
    %cst_50 = arith.constant 1.000000e+00 : f32
    %186 = vector.broadcast %cst_50 : f32 to vector<1x128xf32>
    %187 = arith.cmpf ole, %185, %186 : vector<1x128xf32>
    %cst_51 = arith.constant 5.000000e-01 : f32
    %188 = vector.broadcast %cst_51 : f32 to vector<1x128xf32>
    %189 = arith.mulf %188, %185 : vector<1x128xf32>
    %190 = arith.mulf %189, %185 : vector<1x128xf32>
    %cst_52 = arith.constant 5.000000e-01 : f32
    %191 = vector.broadcast %cst_52 : f32 to vector<1x128xf32>
    %192 = arith.subf %185, %191 : vector<1x128xf32>
    %193 = arith.select %187, %190, %192 : vector<1x128xi1>, vector<1x128xf32>
    %194 = arith.addf %182, %193 : vector<1x128xf32>
    %195 = vector.extract_strided_slice %4 {offsets = [3, 0], sizes = [1, 128], strides = [1, 1]} : vector<4x128xf32> to vector<1x128xf32>
    %196 = arith.subf %159, %195 : vector<1x128xf32>
    %197 = math.absf %196 : vector<1x128xf32>
    %cst_53 = arith.constant 1.000000e+00 : f32
    %198 = vector.broadcast %cst_53 : f32 to vector<1x128xf32>
    %199 = arith.cmpf ole, %197, %198 : vector<1x128xf32>
    %cst_54 = arith.constant 5.000000e-01 : f32
    %200 = vector.broadcast %cst_54 : f32 to vector<1x128xf32>
    %201 = arith.mulf %200, %197 : vector<1x128xf32>
    %202 = arith.mulf %201, %197 : vector<1x128xf32>
    %cst_55 = arith.constant 5.000000e-01 : f32
    %203 = vector.broadcast %cst_55 : f32 to vector<1x128xf32>
    %204 = arith.subf %197, %203 : vector<1x128xf32>
    %205 = arith.select %199, %202, %204 : vector<1x128xi1>, vector<1x128xf32>
    %206 = arith.addf %194, %205 : vector<1x128xf32>
    %cst_56 = arith.constant 0.000000e+00 : f32
    %207 = vector.broadcast %cst_56 : f32 to vector<1x128xf32>
    %208 = arith.select %91, %206, %207 : vector<1x128xi1>, vector<1x128xf32>
    %209 = vector.shape_cast %208 : vector<1x128xf32> to vector<1x1x128xf32>
    %cst_57 = arith.constant dense<0.000000e+00> : vector<1xf32>
    %210 = vector.multi_reduction <add>, %209, %cst_57 [1, 2] : vector<1x1x128xf32> to vector<1xf32>
    %211 = vector.shape_cast %210 : vector<1xf32> to vector<1x1x1xf32>
    %212 = vector.extract %211[0, 0, 0] : f32 from vector<1x1x1xf32>
    %213 = tpu.iota {dimensions = array<i32: 0>} : vector<8x128xi32>
    %c0_i32 = arith.constant 0 : i32
    %214 = vector.broadcast %c0_i32 : i32 to vector<8x128xi32>
    %215 = arith.cmpi eq, %213, %214 : vector<8x128xi32>
    %c1_i32 = arith.constant 1 : i32
    %216 = vector.broadcast %c1_i32 : i32 to vector<8x128xi32>
    %217 = arith.cmpi eq, %213, %216 : vector<8x128xi32>
    %c2_i32 = arith.constant 2 : i32
    %218 = vector.broadcast %c2_i32 : i32 to vector<8x128xi32>
    %219 = arith.cmpi eq, %213, %218 : vector<8x128xi32>
    %cst_58 = arith.constant 0.000000e+00 : f32
    %220 = vector.broadcast %98 : f32 to vector<8x128xf32>
    %221 = vector.broadcast %cst_58 : f32 to vector<8x128xf32>
    %222 = arith.select %219, %220, %221 : vector<8x128xi1>, vector<8x128xf32>
    %223 = vector.broadcast %212 : f32 to vector<8x128xf32>
    %224 = arith.select %217, %223, %222 : vector<8x128xi1>, vector<8x128xf32>
    %225 = vector.broadcast %131 : f32 to vector<8x128xf32>
    %226 = arith.select %215, %225, %224 : vector<8x128xi1>, vector<8x128xf32>
    %c0_i32_59 = arith.constant 0 : i32
    %227 = arith.cmpi eq, %arg2, %c0_i32_59 : i32
    %228 = arith.extui %227 : i1 to i32
    %c0_i32_60 = arith.constant 0 : i32
    %229 = arith.cmpi ne, %228, %c0_i32_60 : i32
    scf.if %229 {
      %c0_63 = arith.constant 0 : index
      %c0_64 = arith.constant 0 : index
      %c0_65 = arith.constant 0 : index
      %233 = vector.load %arg8[%c0_63, %c0_64, %c0_65] : memref<1x8x128xf32, #tpu.memory_space<vmem>>, vector<1x8x128xf32>
      %234 = vector.shape_cast %233 : vector<1x8x128xf32> to vector<8x128xf32>
      %235 = vector.shape_cast %226 : vector<8x128xf32> to vector<1x8x128xf32>
      tpu.vector_store %arg8[%c0_63, %c0_64, %c0_65], %235 {strides = array<i32>} : memref<1x8x128xf32, #tpu.memory_space<vmem>>, vector<1x8x128xf32>,
    } else {
    }
    %c0_i32_61 = arith.constant 0 : i32
    %230 = arith.cmpi ne, %arg2, %c0_i32_61 : i32
    %231 = arith.extui %230 : i1 to i32
    %c0_i32_62 = arith.constant 0 : i32
    %232 = arith.cmpi ne, %231, %c0_i32_62 : i32
    scf.if %232 {
      %c0_63 = arith.constant 0 : index
      %c0_64 = arith.constant 0 : index
      %c0_65 = arith.constant 0 : index
      %233 = vector.load %arg8[%c0_63, %c0_64, %c0_65] : memref<1x8x128xf32, #tpu.memory_space<vmem>>, vector<1x8x128xf32>
      %234 = vector.shape_cast %233 : vector<1x8x128xf32> to vector<8x128xf32>
      %235 = arith.addf %234, %226 : vector<8x128xf32>
      %c0_66 = arith.constant 0 : index
      %c0_67 = arith.constant 0 : index
      %c0_68 = arith.constant 0 : index
      %236 = vector.load %arg8[%c0_66, %c0_67, %c0_68] : memref<1x8x128xf32, #tpu.memory_space<vmem>>, vector<1x8x128xf32>
      %237 = vector.shape_cast %236 : vector<1x8x128xf32> to vector<8x128xf32>
      %238 = vector.shape_cast %235 : vector<8x128xf32> to vector<1x8x128xf32>
      tpu.vector_store %arg8[%c0_66, %c0_67, %c0_68], %238 {strides = array<i32>} : memref<1x8x128xf32, #tpu.memory_space<vmem>>, vector<1x8x128xf32>,
    } else {
    }
    return
  }
  func.func @transform_0(%arg0: i32, %arg1: i32, %arg2: i32) -> (i32, i32, i32) {
    %c2_i32 = arith.constant 2 : i32
    %0 = arith.muli %arg1, %c2_i32 : i32
    %1 = arith.addi %0, %arg2 : i32
    %c0_i32 = arith.constant 0 : i32
    %c0_i32_0 = arith.constant 0 : i32
    return %arg0, %c0_i32, %1 : i32, i32, i32
  }
  func.func @transform_1(%arg0: i32, %arg1: i32, %arg2: i32) -> (i32, i32, i32) {
    %c2_i32 = arith.constant 2 : i32
    %0 = arith.muli %arg1, %c2_i32 : i32
    %1 = arith.addi %0, %arg2 : i32
    %c0_i32 = arith.constant 0 : i32
    %c0_i32_0 = arith.constant 0 : i32
    return %arg0, %c0_i32, %1 : i32, i32, i32
  }
  func.func @transform_2(%arg0: i32, %arg1: i32, %arg2: i32) -> (i32, i32, i32) {
    %c2_i32 = arith.constant 2 : i32
    %0 = arith.muli %arg1, %c2_i32 : i32
    %1 = arith.addi %0, %arg2 : i32
    %c0_i32 = arith.constant 0 : i32
    %c0_i32_0 = arith.constant 0 : i32
    %c0_i32_1 = arith.constant 0 : i32
    return %c0_i32, %c0_i32_0, %1 : i32, i32, i32
  }
  func.func @transform_3(%arg0: i32, %arg1: i32, %arg2: i32) -> (i32, i32, i32) {
    %c0_i32 = arith.constant 0 : i32
    %c0_i32_0 = arith.constant 0 : i32
    %c0_i32_1 = arith.constant 0 : i32
    return %arg0, %c0_i32, %c0_i32_0 : i32, i32, i32
  }
  func.func @transform_4(%arg0: i32, %arg1: i32, %arg2: i32) -> (i32, i32, i32) {
    %c0_i32 = arith.constant 0 : i32
    %c0_i32_0 = arith.constant 0 : i32
    %c0_i32_1 = arith.constant 0 : i32
    return %arg0, %c0_i32, %c0_i32_0 : i32, i32, i32
  }
  func.func @transform_5(%arg0: i32, %arg1: i32, %arg2: i32) -> (i32, i32, i32) {
    %c2_i32 = arith.constant 2 : i32
    %0 = arith.muli %arg0, %c2_i32 : i32
    %1 = arith.addi %0, %arg1 : i32
    %c0_i32 = arith.constant 0 : i32
    %c0_i32_0 = arith.constant 0 : i32
    %c0_i32_1 = arith.constant 0 : i32
    return %1, %c0_i32, %c0_i32_0 : i32, i32, i32
  }
}

</mosaic_0001>

<bundles_post_ra>
// kernel: tpu_custom_call.1
= control target key start
LH: loop header
LB: loop body
LE: loop exit
PB: predicated region body
PF: predicated region fallthrough
CT: control target
= control target key end

     0   :  { %s1643_s0 = inlined_call_operand.vmem [shape: bf16[2,4,512], index: 0, kind: input, shape index: {}]   ;;  %s1644_s1 = inlined_call_operand.vmem [shape: f32[2,4,512], index: 1, kind: input, shape index: {}]   ;;  %s1645_s2 = inlined_call_operand.hbm [shape: f32[1,4,512], index: 2, kind: input, shape index: {}]   ;;  %s1646_s3 = inlined_call_operand.vmem [shape: f32[2,8,5], index: 3, kind: input, shape index: {}]   ;;  %s1647_s4 = inlined_call_operand.vmem [shape: f32[2,5,8], index: 4, kind: input, shape index: {}]   ;;  %s1648_s5 = inlined_call_operand.hbm [shape: f32[4,8,128], index: 5, kind: output, shape index: {}]  }
   0x1   :  { %1657 = sst [smem:[#allocation13_spill]] %s1648_s5 }
   0x2   :  { %10 = vsyncpa [#allocation3], 0 }
   0x3   :  { %12 = vsyncpa [#allocation3 + $0x1], 0 }
   0x4   :  { %13 = vsyncpa [#allocation4], 0 }
   0x5   :  { %15 = vsyncpa [#allocation4 + $0x1], 0  ;;  %s1294_s18 = smov 0   ;;  %s1296_s19 = smov 0  }
   0x6   :  { %s1298_s20 = smov 0   ;;  %s1300_s21 = smov 0  }
   0x7   :  { %s1302_s22 = smov 0   ;;  %s1304_s23 = smov 0  }
   0x8   :  { %s1306_s24 = smov 0   ;;  %s1308_s25 = smov 0  }
   0x9   :  { %s1310_s26 = smov 0   ;;  %s1312_s27 = smov 0  }
   0xa   :  { %s1314_s28 = smov 0   ;;  %s1316_s29 = smov 0  }
   0xb   :  { %s1318_s30 = smov 0  }
   0xc LB: > { %1658 = sst [smem:[#allocation8_spill]] %s1237_s27  ;;  %s1649_s6 = sadd.s32 4294967295, %s1249_s30   ;;  %s1249_s30 = sphi %s1318_s30, %s21_s30   ;;  %s1245_s29 = sphi %s1316_s29, %s1694_s29   ;;  %s1241_s28 = sphi %s1314_s28, %s1693_s28   ;;  %s1237_s27 = sphi %s1312_s27, %s1692_s27   ;;  %s1233_s26 = sphi %s1310_s26, %s1691_s26   ;;  %s1229_s25 = sphi %s1308_s25, %s1690_s25   ;;  %s1225_s24 = sphi %s1306_s24, %s1678_s24   ;;  %s1221_s23 = sphi %s1304_s23, %s1689_s23   ;;  %s1217_s22 = sphi %s1302_s22, %s1688_s22   ;;  %s1213_s21 = sphi %s1300_s21, %s1687_s21   ;;  %s1209_s20 = sphi %s1298_s20, %s1686_s20   ;;  %s1205_s19 = sphi %s1296_s19, %s1685_s19   ;;  %s1201_s18 = sphi %s1294_s18, %s1684_s18  }
   0xd   : > { %1659 = sst [smem:[#allocation9_spill]] %s1245_s29  ;;  %s33_s8 = sadd.s32 1, %s1237_s27 }
   0xe   : > { %s36_s9 = sadd.s32 1, %s1241_s28  ;;  %p34_p0 = scmp.ge.s32.totalorder %s33_s8, 2 }
   0xf   : > { %s40_s10 = sadd.s32 1, %s1245_s29  ;;  %s890_s11 = sshll.u32 %s1241_s28, 1 }
  0x10   : > { %s115_s12 = sadd.s32 1, %s1221_s23  ;;  %s1696_s8 = smov (%p34_p0, %s33_s8), 0 }
  0x11   : > { %1660 = sst [smem:[#allocation10_spill]] %s1696_s8  ;;  %s1698_s9 = smov (!%p34_p0, %s36_s9), %s1241_s28 }
  0x12   : > { %s1370_s13 = sadd.s32 %s1237_s27, %s890_s11  ;;  %p122_p1 = scmp.ne.s32.totalorder %s1221_s23, %s1217_s22 }
  0x13   : > { %p38_p2 = scmp.ge.s32.totalorder %s1698_s9, 2  ;;  %p123_p3 = scmp.eq.s32.totalorder %s1249_s30, 0 }
  0x14   : > { %p128_p4 = scmp.ne.s32.totalorder %s1217_s22, %s1213_s21  ;;  %p129_p5 = scmp.eq.s32.totalorder %s1649_s6, 0 }
  0x15   : > { %s1700_s9 = smov (%p38_p2, %s1698_s9), 0  ;;  %s1702_s10 = smov (!%p38_p2, %s40_s10), %s1245_s29 }
  0x16   : > { %1661 = sst [smem:[#allocation11_spill]] %s1700_s9  ;;  %s891_s14 = sshll.u32 %s1700_s9, 1 }
  0x17   : > { %p1383_p6 = por %p123_p3, %p122_p1  ;;  %p42_p7 = scmp.ge.s32.totalorder %s1702_s10, 2 }
  0x18   : > { %s111_s16 = sadd.s32 %s891_s14, %s1696_s8  ;;  %p1389_p8 = por %p129_p5, %p128_p4 }
  0x19   : > { %s112_s17 = ssub.s32 %s1370_s13, %s111_s16  ;;  %s1704_s10 = smov (%p42_p7, %s1702_s10), 0 }
  0x1a   : > { %1664 = sst [smem:[#allocation12_spill]] %s1704_s10  ;;  %p113_p9 = scmp.eq.s32.totalorder %s112_s17, 0 }
  0x1b   : > { %s892_s11 = sshll.u32 %s1245_s29, 1  ;;  %s893_s6 = sshll.u32 %s1704_s10, 1 }
  0x1c   : > { %s191_s7 = sadd.s32 %s1241_s28, %s892_s11  ;;  %s193_s14 = sadd.s32 %s893_s6, %s1700_s9 }
  0x1d   : > { %s1399_s27 = scalar_select %p113_p9, %s1221_s23, %s115_s12  }
  0x1e   : > { %s197_s8 = sadd.s32 1, %s1209_s20  ;;  %s194_s16 = ssub.s32 %s191_s7, %s193_s14 }
  0x1f   : > { %p207_p10 = scmp.ne.s32.totalorder %s1209_s20, %s1205_s19  ;;  %p195_p11 = scmp.eq.s32.totalorder %s194_s16, 0 }
  0x20   : > { %s1665_s5 = sadd.s32 4294967295, %s1249_s30   ;;  %p213_p13 = scmp.ne.s32.totalorder %s1205_s19, %s1201_s18 }
  0x21   : > { %p208_p12 = scmp.eq.s32.totalorder %s1665_s5, 7  ;;  %s1666_s17 = sadd.s32 4294967294, %s1249_s30  }
  0x22   : > { %p214_p0 = scmp.eq.s32.totalorder %s1666_s17, 7  ;;  %p948_p3 = scmp.lt.s32.totalorder %s1249_s30, 8 }
  0x23   : > { %s1412_s29 = scalar_select %p195_p11, %s1209_s20, %s197_s8  }
  0x24   : > { %p1414_p1 = por %p208_p12, %p207_p10  ;;  %p1418_p2 = por %p214_p0, %p213_p13 }
  0x25   : > { %s264_s7 = sand.u32 1, %s1221_s23   ;;  %s898_s12 = sshll.u32 %s1370_s13, 6 }
  0x26   : > { %s1667_s11 = scalar_select %p1414_p1, 1, 0 }
  0x27   : > { %s1668_s6 = scalar_select %p1418_p2, 1, 0 }
  0x28   : > { %s896_s14 = sshll.u32 %s264_s7, 2  ;;  %s1428_s10 = scalar_lea.hbm %s1645_s2, %s898_s12 }
  0x29   : > { %s268_s8 = scalar_lea.vmem [#allocation2], %s896_s14  ;;  %p1432_p4 = pnand %p948_p3, %p1383_p6 }
  0x2a   : > { %s277_s17 = sshll.u32 %s268_s8, 4  ;;  %s265_s13 = scalar_lea.sflag [#allocation3], %s264_s7  ;;  %s1436_s17 = int_to_ptr.vmem [resolvable:$true] %s277_s17 }
  0x2b   : > { %s1081_s12 = scalar_lea.hbm %s1428_s10, 64  ;;  %p1083_p10 = pneg %p1432_p4 }
  0x2c   : > { %p1082_p9 = scmp.ne.s32.totalorder %s1428_s10, %s1081_s12  ;;  %s1086_s16 = scalar_lea.hbm %s1645_s2, 256 }
  0x2d   : > { %p1087_p6 = scmp.lt.u32.totalorder %s1428_s10, %s1645_s2  ;;  %p1088_p13 = scmp.lt.u32.totalorder %s1086_s16, %s1081_s12 }
  0x2e   : > { %p1084_p11 = pnand %p1083_p10, %p1082_p9  ;;  %p1090_p3 = scmp.lt.u32.totalorder %s1081_s12, %s1428_s10 }
  0x2f   : > { %p1089_p0 = por %p1088_p13, %p1087_p6 }
  0x30   : > { %p1085_p12 = pneg %p1084_p11 }
  0x31   : > { %p1091_p5 = por %p1090_p3, %p1089_p0 }
  0x33   : > { %p1092_p7 = pnand %p1091_p5, %p1085_p12 }
  0x35   : > { %1095 = shalt.err (!%p1092_p7)
}
  0x36   : > { %s1096_s7 = scalar_lea.vmem %s1436_s17, 64  ;;  %s1251_s15 = smov [#allocation2]  }
  0x37   : > { %p1097_p9 = scmp.ne.s32.totalorder %s1436_s17, %s1096_s7  ;;  %s1101_s14 = sshll.u32 %s1251_s15, 4  ;;  %s1102_s14 = int_to_ptr.vmem [resolvable:$false] %s1101_s14 }
  0x38   : > { %s1103_s5 = scalar_lea.vmem %s1102_s14, 128  ;;  %p1104_p1 = scmp.lt.s32.totalorder %s1436_s17, %s1102_s14 }
  0x39   : > { %p1099_p11 = pnand %p1097_p9, %p1083_p10  ;;  %p1105_p6 = scmp.lt.s32.totalorder %s1103_s5, %s1096_s7 }
  0x3b   : > { %p1100_p2 = pneg %p1099_p11  ;;  %p1106_p13 = por %p1105_p6, %p1104_p1 }
  0x3d   : > { %p1107_p0 = pnand %p1106_p13, %p1100_p2 }
  0x3f   : > { %1110 = shalt.err (!%p1107_p0)
}
  0x40   : > { %943 = dma.hbm_to_vmem [thread:$0]  (!%p1432_p4), %s1428_s10, 64, %s1436_s17, %s265_s13  }
  0x41   : > { %p1670_p5 = scmp.lt.s32.totalorder %s1249_s30, 9  ;;  %p1671_p7 = scmp.ge.s32.totalorder %s1249_s30, 1 }
  0x43   : > { %p297_p10 = pnand %p1671_p7, %p1670_p5 }
  0x44   : > { %s302_s12 = sand.u32 (!%p297_p10), 1, %s1217_s22  }
  0x45   : > { %300 = sbr.rel (%p297_p10) target bundleno = 997 (0x3e5), region = 40  ;;  %s1470_s16 = sshll.u32 (!%p297_p10), %s302_s12, 2 }
  0x46   : > { %s303_s8 = scalar_lea.sflag (!%p297_p10), [#allocation3], %s302_s12  ;;  %s306_s7 = scalar_lea.vmem (!%p297_p10), [#allocation2], %s1470_s16 }
  0x4c   : > { %1192 = dma.done.wait (%p1389_p8), %s303_s8, 64  }
  0x4d   : > { %1194 = vsyncadd (%p1389_p8), %s303_s8, 4294967232  ;;  %p363_p1 = scmp.lt.s32.totalorder %s1233_s26, 1  ;;  %v1252_v0 = vmov 2   ;;  %v1253_v1 = vmov 3   ;;  %s1254_s21 = smov 2   ;;  %v1255_v3 = vmov 0   ;;  %v427_v12 = vlaneseq }
  0x4e   : > { %1065 = vset.pattern.permute.xlu1 %v1252_v0  ;;  %1067 = vset.pattern.permute.xlu0 %v1253_v1  ;;  %v1256_v4 = vmov 1   ;;  %s1257_s14 = smov 127   ;;  %v1258_v8 = vmov 4   ;;  %v1259_v11 = vmov 0.0   ;;  %s358_s5 = sand.u32 1, %s1205_s19   ;;  %vm1260_vm1 = vmmov 0  }
  0x4f   : > { %s1479_s9 = scalar_select %p363_p1, %s1233_s26, 1  ;;  %925 = vmatprep.subr.mxu0 %v1259_v11  ;;  %927 = vmatprep.mubr.msk.f32.mxu0 %vm1260_vm1, %v1259_v11  ;;  %v1492_v14 = vshrl.u32 %v427_v12, 7  ;;  %v1497_v16 = vld [vmem:[%s306_s7] sm:$0xf]  ;;  %vm592_vm3 = vcmask 1040384   ;;  %vm513_vm9 = vcmask 64512  }
  0x50   : > { %s1490_s12 = sshll.u32 %s358_s5, 3  ;;  %v404_v21 = vrot.slane %v1497_v16, 6  ;;  %vm626_vm14 = vcmask 1043456   ;;  %p916_p2 = scmp.ne.s32.totalorder %s1225_s24, 0 }
  0x51   : > { %s908_s10 = sshll.u32 %s1479_s9, 3  ;;  %v429_v15 = vsub.s32 2, %v1492_v14  ;;  %v438_v18 = vsub.s32 0, %v1492_v14  ;;  %v458_v19 = vsub.s32 1, %v1492_v14  ;;  %v449_v20 = vsub.s32 3, %v1492_v14  ;;  %s903_s13 = sshll.u32 %s1479_s9, 2 }
  0x52   : > { %s390_s15 = scalar_lea.vmem %s1646_s3, %s908_s10  ;;  %v1508_v26 = vsub.f32 %v1497_v16, %v404_v21  ;;  %s394_s7 = scalar_lea.vmem %s1647_s4, %s908_s10  ;;  %v603_v21 = vcvt.s32.f32 %v1492_v14 }
  0x53   : > { %v401_v2 = vld [vmem:[%s390_s15] sm:$0xff]  ;;  %v430_v22 = vrot.slane %v1497_v16, %v429_v15  ;;  %v439_v23 = vrot.slane %v1497_v16, %v438_v18  ;;  %v459_v24 = vrot.slane %v1497_v16, %v458_v19  ;;  %v450_v25 = vrot.slane %v1497_v16, %v449_v20  ;;  %s902_s10 = sshll.u32 %s1229_s25, 1 }
  0x54   : > { %418 = vrot.lane.b32.xlu0 %v401_v2, %s1254_s21  ;;  %432 = vperm.xlu1 %1065, %v401_v2   ;;  %vm416_vm0 = vcmp.ne.f32.partialorder %v401_v2, -1.0  ;;  %v413_v33 = vrot.slane %v1508_v26, 1  ;;  %s362_s17 = sadd.s32 %s1225_s24, %s902_s10  ;;  %v606_v18 = vsub.s32 4, %v1492_v14  ;;  %v407_v20 = vmul.f32 0.5, %v1508_v26 }
  0x55   : > { %v485_v7 = vsel %vm416_vm0, 1, %v1255_v3  ;;  %p365_p8 = scmp.lt.s32.totalorder %s362_s17, 3 }
  0x56   : > { %v415_v36 = vmul.f32 %v413_v33, %v1508_v26 }
  0x57   : > { %s1706_s17 = smov (!%p365_p8, %s362_s17), 3 }
  0x58   : > { %1066 = vset.pattern.permute.xlu1 %v1255_v3  ;;  %v471_v39 = vrot.slane %v415_v36, %v429_v15  ;;  %v402_v3 = vld [vmem:[%s394_s7] sm:$0x1f]  ;;  %s1529_s15 = sadd.s32 %s903_s13, %s1706_s17 }
  0x59   : > { %441 = vperm.xlu1 %1066, %v401_v2   ;;  %s904_s21 = sshll.u32 %s1529_s15, 1  ;;  %s907_s9 = sshll.u32 %s1529_s15, 2 }
  0x5a   : > { %s370_s8 = scalar_lea.vmem %s1643_s0, %s904_s21  ;;  %s382_s17 = scalar_lea.vmem %s1644_s1, %s907_s9 }
  0x5b   : > { %v397_v12 = vld [vmem:[%s370_s8] sm:$0x3] }
  0x5d   : > { %1068 = vset.pattern.permute.xlu1 %v1256_v4  ;;  %v1261_v4 = vmov 1.0  }
  0x5e   : > { %461 = vperm.xlu1 %1068, %v401_v2  }
  0x62   : > { %1069 = vset.pattern.permute.xlu1 %v1252_v0 }
  0xc6   : > { %v419_v5 = vpop.permute.xlu0 %418 }
  0xc7   : > { %v421_v6 = vsub.f32 %v401_v2, %v419_v5 }
  0xc9   : > { %423 = vrot.lane.b32.xlu0 %v421_v6, %s1257_s14  ;;  %s360_s14 = scalar_lea.vmem [#allocation5], %s1490_s12 }
  0xcd   : > { %452 = vperm.xlu0 %1067, %v401_v2  }
  0xd1   : > { %1070 = vset.pattern.permute.xlu0 %v1258_v8 }
  0xd2   : > { %487 = vperm.xlu0 %1070, %v485_v7  }
  0xd3   : > { %v433_v13 = vpop.permute.xlu1 %432 }
  0xd4   : > { %v435_v29 = vmin.f32 %v430_v22, %v433_v13  ;;  %v398_v13 = vunpack.c.l.bf16 %v397_v12 }
  0xd6   : > { %v611_v15 = vmax.f32 %v398_v13, 0.0001 }
  0xd8   : > { %v442_v17 = vpop.permute.xlu1 %441  ;;  %v612_v19 = vmin.f32 %v611_v15, 0.9999 }
  0xd9   : > { %v444_v30 = vmax.f32 %v439_v23, %v442_v17  ;;  %v648_v17 = vrot.slane %v1508_v26, 2 }
  0xdb   : > { %v445_v34 = vsub.f32 %v435_v29, %v444_v30 }
  0xdd   : > { %v462_v27 = vpop.permute.xlu1 %461  ;;  %v446_v37 = vmax.f32 %v445_v34, 0.0 }
  0xde   : > { %v464_v31 = vmax.f32 %v459_v24, %v462_v27  ;;  %v614_v27 = vsub.f32 1.0, %v612_v19 }
 0x13b   : > { %v424_v9 = vpop.permute.xlu0 %423 }
 0x13c   : > { %v426_v10 = vmul.f32 %v424_v9, %v421_v6 }
 0x13e   : > { %474 = vperm.xlu1 %1069, %v426_v10  }
 0x14c   : > { %v453_v28 = vpop.permute.xlu0 %452 }
 0x14d   : > { %v455_v32 = vmin.f32 %v450_v25, %v453_v28  ;;  %v409_v28 = vrot.slane %v407_v20, 2 }
 0x14f   : > { %v465_v35 = vsub.f32 %v455_v32, %v464_v31  ;;  %v411_v34 = vadd.f32 %v409_v28, %v1497_v16 }
 0x151   : > { %v466_v38 = vmax.f32 %v465_v35, 0.0  ;;  %v488_v48 = vpop.permute.xlu0 %487 }
 0x152   : > { %vm489_vm2 = vcmp.eq.s32.totalorder %v488_v48, 1 }
 0x153   : > { %v467_v41 = vmul.f32 %v466_v38, %v446_v37 }
 0x1bd   : > { %v475_v40 = vpop.permute.xlu1 %474 }
 0x1be   : > { %v477_v42 = vadd.f32 %v475_v40, %v471_v39 }
 0x1c0   : > { %v478_v43 = vsub.f32 %v477_v42, %v467_v41 }
 0x1c2   : > { %v479_v44 = vmax.f32 %v478_v43, 1e-08  ;;  %v399_v43 = vld [vmem:[%s382_s17] sm:$0xf] }
 0x1c4   : > { %1071 = vrcp.f32 %v479_v44 }
 0x1c5   : > { %1073 = vrcp.f32 %v1508_v26 }
 0x1c6   : > { %1075 = vrcp.f32 %v648_v17 }
 0x1ce   : > { %v1072_v45 = vpop.eup %1071 }
 0x1cf   : > { %v481_v46 = vmul.f32 %v1072_v45, %v479_v44  ;;  %v1074_v30 = vpop.eup %1073 }
 0x1d0   : > { %v1076_v38 = vpop.eup %1075 }
 0x1d1   : > { %v482_v47 = vsub.f32 2.0, %v481_v46 }
 0x1d3   : > { %v483_v49 = vmul.f32 %v1072_v45, %v482_v47 }
 0x1d5   : > { %v484_v50 = vmul.f32 %v483_v49, %v467_v41  ;;  %v1262_v41 = vmov 0.75  }
 0x1d7   : > { %v490_v51 = vsel %vm489_vm2, %v484_v50, -1.0  ;;  %vm698_vm2 = vcmp.eq.s32.totalorder %v1492_v14, 2 }
 0x1d8   : > { %v491_v52 = vrot.slane %v490_v51, 4 }
 0x1da   : > { %v492_v53 = vmax.f32 %v490_v51, %v491_v52 }
 0x1dc   : > { %v493_v54 = vrot.slane %v492_v53, 2 }
 0x1de   : > { %v494_v55 = vmax.f32 %v492_v53, %v493_v54 }
 0x1e0   : > { %v495_v56 = vrot.slane %v494_v55, 1 }
 0x1e2   : > { %v1512_v57 = vmax.f32 %v494_v55, %v495_v56 }
 0x1e4   : > { %vm499_vm4 = vcmp.eq.f32.partialorder %v490_v51, %v1512_v57  ;;  %vm588_vm5 = vcmp.ge.f32.partialorder %v1512_v57, 0.4  ;;  %vm587_vm13 = vcmp.lt.f32.partialorder %v1512_v57, 0.3 }
 0x1e5   : > { %v500_v58 = vsel %vm499_vm4, %v1492_v14, 8  ;;  %v913_v59 = vsel %vm588_vm5, 1.0, %v1259_v11  ;;  %vm589_vm15 = vmor %vm587_vm13, %vm588_vm5  ;;  %vm696_vm4 = vcmp.eq.s32.totalorder %v1492_v14, 0 }
 0x1e6   : > { %v501_v60 = vrot.slane %v500_v58, 4  ;;  %v593_v61 = vsel %vm592_vm3, %v913_v59, 0.0 }
 0x1e7   : > { %594 = vadd.xlane.f32.xlu1 %v593_v61 }
 0x1e8   : > { %vm502_vm6 = vcmp.lt.s32.totalorder %v500_v58, %v501_v60 }
 0x1e9   : > { %v503_v62 = vsel %vm502_vm6, %v500_v58, %v501_v60 }
 0x1ea   : > { %v504_v63 = vrot.slane %v503_v62, 2 }
 0x1ec   : > { %vm505_vm7 = vcmp.lt.s32.totalorder %v503_v62, %v504_v63 }
 0x1ed   : > { %v506_v0 = vsel %vm505_vm7, %v503_v62, %v504_v63 }
 0x1ee   : > { %v507_v1 = vrot.slane %v506_v0, 1 }
 0x1f0   : > { %vm508_vm8 = vcmp.lt.s32.totalorder %v506_v0, %v507_v1 }
 0x1f1   : > { %v509_v2 = vsel %vm508_vm8, %v506_v0, %v507_v1 }
 0x1f2   : > { %vm510_vm10 = vcmp.eq.s32.totalorder %v1492_v14, %v509_v2 }
 0x1f3   : > { %926 = vmatpush3.msk.msra.mxu0 %vm510_vm10, %v1261_v4 }
 0x1f4   : > { %928 = vmatmul.mubr.msk.f32.vlgmr.msra.gmra.mrb[0].mxu0 %vm513_vm9, %v402_v3 }
 0x274   : > { %v595_v5 = vpop.xlane.xlu1 %594 }
 0x275   : > { %v596_v6 = vrot.slane %v595_v5, 4 }
 0x277   : > { %v597_v7 = vadd.f32 %v596_v6, %v595_v5 }
 0x279   : > { %v598_v8 = vrot.slane %v597_v7, 2 }
 0x27b   : > { %v599_v9 = vadd.f32 %v598_v8, %v597_v7 }
 0x27d   : > { %v600_v10 = vrot.slane %v599_v9, 1 }
 0x27f   : > { %v601_v11 = vadd.f32 %v600_v10, %v599_v9 }
 0x281   : > { %930 = vpush %v601_v11 }
 0x2b2   : > { %s931_s13 = spop %930 }
 0x2c7   : > { %v583_v22 = vpop.f32.mrb[0].mxu0 }
 0x2c8   : > { %v607_v23 = vrot.slane %v583_v22, %v606_v18  ;;  %v638_v24 = vrot.slane %v583_v22, 6  ;;  %v929_v25 = vpop.f32.mrb[1].mxu0 }
 0x2ca   : > { %vm608_vm11 = vcmp.eq.f32.partialorder %v603_v21, %v607_v23  ;;  %v640_v29 = vsub.f32 %v583_v22, %v638_v24 }
 0x2cb   : > { %vm1542_vm12 = vmand %vm588_vm5, %vm608_vm11 }
 0x2cc   : > { %v641_v26 = vmul.f32 0.5, %v640_v29  ;;  %v646_v32 = vmax.f32 %v640_v29, 1.0  ;;  %v616_v33 = vsel %vm1542_vm12, %v612_v19, %v614_v27  ;;  %v613_v42 = vsel %vm1542_vm12, 0.25, %v1262_v41 }
 0x2cd   : > { %1077 = vlog2.f32 %v616_v33  ;;  %v615_v16 = vsel %vm1542_vm12, %v614_v27, %v612_v19  ;;  %v699_v29 = vstv %s931_s13 }
 0x2ce   : > { %v643_v35 = vrot.slane %v641_v26, 2  ;;  %v655_v36 = vmul.f32 %v1074_v30, %v646_v32  ;;  %v620_v45 = vmul.f32 %v615_v16, %v613_v42  ;;  %v700_v30 = vsel %vm698_vm2, %v699_v29, 0.0 }
 0x2d0   : > { %v645_v37 = vadd.f32 %v643_v35, %v583_v22  ;;  %1079 = vlog2.f32 %v655_v36  ;;  %v621_v53 = vmul.f32 %v620_v45, %v615_v16 }
 0x2d2   : > { %v647_v39 = vsub.f32 %v645_v37, %v411_v34 }
 0x2d4   : > { %v651_v40 = vmul.f32 %v1076_v38, %v647_v39 }
 0x2d6   : > { %v653_v44 = vmul.f32 10.0, %v651_v40 }
 0x2d7   : > { %v1078_v46 = vpop.eup %1077 }
 0x2d8   : > { %v660_v47 = vsub.f32 %v653_v44, %v399_v43  ;;  %v618_v48 = vmul.f32 0.6931472, %v1078_v46 }
 0x2da   : > { %v1080_v49 = vpop.eup %1079  ;;  %v661_v50 = vand.u32 2147483647, %v660_v47  ;;  %v619_v52 = vsub.f32 0.0, %v618_v48 }
 0x2db   : > { %v657_v51 = vmul.f32 0.6931472, %v1080_v49 }
 0x2dc   : > { %v663_v54 = vmul.f32 0.5, %v661_v50  ;;  %v622_v56 = vmul.f32 %v621_v53, %v619_v52  ;;  %v914_v61 = vadd.f32 -0.5, %v661_v50  ;;  %vm662_vm0 = vcmp.le.f32.partialorder %v661_v50, 1.0 }
 0x2dd   : > { %v659_v55 = vmul.f32 5.0, %v657_v51 }
 0x2de   : > { %v664_v58 = vmul.f32 %v663_v54, %v661_v50  ;;  %v625_v60 = vsel %vm589_vm15, %v622_v56, 0.0 }
 0x2df   : > { %v671_v59 = vsub.f32 %v659_v55, %v399_v43  ;;  %v627_v62 = vsel %vm626_vm14, %v625_v60, 0.0 }
 0x2e0   : > { %628 = vadd.xlane.f32.xlu0 %v627_v62  ;;  %v666_v0 = vsel %vm662_vm0, %v664_v58, %v914_v61 }
 0x2e1   : > { %v672_v63 = vand.u32 2147483647, %v671_v59  ;;  %v668_v2 = vrot.slane %v666_v0, 1 }
 0x2e3   : > { %v674_v1 = vmul.f32 0.5, %v672_v63  ;;  %v915_v4 = vadd.f32 -0.5, %v672_v63  ;;  %vm673_vm1 = vcmp.le.f32.partialorder %v672_v63, 1.0  ;;  %v670_v6 = vadd.f32 %v668_v2, %v666_v0 }
 0x2e5   : > { %v675_v3 = vmul.f32 %v674_v1, %v672_v63 }
 0x2e7   : > { %v677_v5 = vsel %vm673_vm1, %v675_v3, %v915_v4 }
 0x2e8   : > { %v679_v7 = vrot.slane %v677_v5, 2  ;;  %v682_v9 = vrot.slane %v677_v5, 3 }
 0x2ea   : > { %v681_v8 = vadd.f32 %v679_v7, %v670_v6 }
 0x2ec   : > { %v684_v10 = vadd.f32 %v682_v9, %v681_v8 }
 0x2ee   : > { %v685_v11 = vsel %vm588_vm5, %v684_v10, 0.0 }
 0x2ef   : > { %v686_v12 = vsel %vm592_vm3, %v685_v11, 0.0  ;;  %vm697_vm3 = vcmp.eq.s32.totalorder %v1492_v14, 1 }
 0x2f0   : > { %687 = vadd.xlane.f32.xlu1 %v686_v12 }
 0x36d   : > { %v629_v13 = vpop.xlane.xlu0 %628 }
 0x36e   : > { %v630_v15 = vrot.slane %v629_v13, 4 }
 0x370   : > { %v631_v17 = vadd.f32 %v630_v15, %v629_v13 }
 0x372   : > { %v632_v18 = vrot.slane %v631_v17, 2 }
 0x374   : > { %v633_v19 = vadd.f32 %v632_v18, %v631_v17 }
 0x376   : > { %v634_v20 = vrot.slane %v633_v19, 1 }
 0x378   : > { %v635_v21 = vadd.f32 %v634_v20, %v633_v19 }
 0x37a   : > { %932 = vpush %v635_v21 }
 0x37d   : > { %v688_v22 = vpop.xlane.xlu1 %687 }
 0x37e   : > { %v689_v23 = vrot.slane %v688_v22, 4 }
 0x380   : > { %v690_v24 = vadd.f32 %v689_v23, %v688_v22 }
 0x382   : > { %v691_v25 = vrot.slane %v690_v24, 2 }
 0x384   : > { %v692_v27 = vadd.f32 %v691_v25, %v690_v24 }
 0x386   : > { %v693_v28 = vrot.slane %v692_v27, 1 }
 0x388   : > { %v694_v57 = vadd.f32 %v693_v28, %v692_v27 }
 0x38a   : > { %934 = vpush %v694_v57 }
 0x3ab   : > { %s933_s15 = spop %932 }
 0x3ac   : > { %v703_v26 = vstv %s933_s15 }
 0x3b8   : > { %708 = sbr.rel (%p916_p2) target bundleno = 960 (0x3c0), region = 48 }
 0x3bb   : > { %s935_s21 = spop %934 }
 0x3bc   : > { %v701_v31 = vstv %s935_s21 }
 0x3bd   : > { %v702_v32 = vsel %vm697_vm3, %v701_v31, %v700_v30 }
 0x3be   : > { %v704_v33 = vsel %vm696_vm4, %v703_v26, %v702_v32 }
 0x3bf   : > { %709 = vst [vmem:[%s360_s14] sm:$0xff] %v704_v33 }
 0x3c0 PF: > { %p917_p4 = scmp.eq.s32.totalorder %s1225_s24, 0 }
 0x3c2   : > { %713 = sbr.rel (%p917_p4) target bundleno = 970 (0x3ca), region = 52 }
 0x3c6   : > { %v714_v34 = vld [vmem:[%s360_s14] sm:$0xff] (!%p917_p4) }
 0x3c7   : > { %v715_v35 = vadd.f32 (!%p917_p4), %v714_v34, %v704_v33 }
 0x3c9   : > { %716 = vst [vmem:[%s360_s14] sm:$0xff] %v715_v35 }
 0x3ca PF: > { %s919_s16 = sshll.u32 %s1233_s26, 1  ;;  %s733_s9 = sshll.u32 %s360_s14, 4  ;;  %s1571_s9 = int_to_ptr.vmem [resolvable:$true] %s733_s9 }
 0x3cb   : > { %s726_s8 = sadd.s32 %s1229_s25, %s919_s16  ;;  %s1674_s17 = sld [smem:[#allocation13_spill]] }
 0x3cc   : > { %s920_s12 = sshll.u32 %s726_s8, 7  ;;  %s718_s13 = scalar_lea.sflag [#allocation4], %s358_s5 }
 0x3cd   : > { %s1111_s15 = scalar_lea.vmem %s1571_s9, 128  ;;  %p1675_p3 = scmp.ne.s32.totalorder %s1667_s11, 0 }
 0x3ce   : > { %p1112_p12 = scmp.ne.s32.totalorder %s1571_s9, %s1111_s15  ;;  %s1263_s26 = smov [#allocation5]  }
 0x3cf   : > { %s1115_s25 = sshll.u32 %s1263_s26, 4  ;;  %s1116_s25 = int_to_ptr.vmem [resolvable:$false] %s1115_s25 }
 0x3d0   : > { %p1113_p9 = pnand %p1112_p12, %p1675_p3  ;;  %s1117_s21 = scalar_lea.vmem %s1116_s25, 256 }
 0x3d1   : > { %s731_s24 = scalar_lea.hbm %s1674_s17, %s920_s12  ;;  %p1118_p6 = scmp.lt.s32.totalorder %s1571_s9, %s1116_s25 }
 0x3d2   : > { %p1114_p11 = pneg %p1113_p9  ;;  %p1119_p13 = scmp.lt.s32.totalorder %s1117_s21, %s1111_s15 }
 0x3d4   : > { %p1120_p0 = por %p1119_p13, %p1118_p6 }
 0x3d6   : > { %p1121_p5 = pnand %p1120_p0, %p1114_p11 }
 0x3d8   : > { %1124 = shalt.err (!%p1121_p5)
}
 0x3d9   : > { %s1125_s14 = scalar_lea.hbm %s731_s24, 128  ;;  %s1129_s8 = scalar_lea.hbm %s1674_s17, 512 }
 0x3da   : > { %p1126_p7 = scmp.ne.s32.totalorder %s731_s24, %s1125_s14  ;;  %p1130_p8 = scmp.lt.u32.totalorder %s731_s24, %s1674_s17 }
 0x3db   : > { %p1131_p2 = scmp.lt.u32.totalorder %s1129_s8, %s1125_s14  ;;  %p1133_p12 = scmp.lt.u32.totalorder %s1125_s14, %s731_s24 }
 0x3dc   : > { %p1127_p10 = pnand %p1126_p7, %p1675_p3 }
 0x3dd   : > { %p1132_p4 = por %p1131_p2, %p1130_p8 }
 0x3de   : > { %p1128_p1 = pneg %p1127_p10 }
 0x3df   : > { %p1134_p9 = por %p1133_p12, %p1132_p4 }
 0x3e1   : > { %p1135_p11 = pnand %p1134_p9, %p1128_p1 }
 0x3e3   : > { %1138 = shalt.err (!%p1135_p11)
}
 0x3e4   : > { %938 = dma.vmem_to_hbm [thread:$0]  (%p1675_p3), %s1571_s9, 128, %s731_s24, %s718_s13  }
 0x3e5 PF: > { %p949_p6 = scmp.ge.s32.totalorder %s1249_s30, 2  ;;  %s745_s10 = sand.u32 1, %s1201_s18  }
 0x3e6   : > { %p1676_p13 = scmp.ne.s32.totalorder %s1668_s6, 0  ;;  %s746_s15 = scalar_lea.sflag [#allocation4], %s745_s10 }
 0x3e8   : > { %p945_p0 = pnand %p949_p6, %p1676_p13 }
 0x3ea   : > { %1196 = dma.done.wait (!%p945_p0), %s746_s15, 128  }
 0x3eb   : > { %1198 = vsyncadd (!%p945_p0), %s746_s15, 4294967168  ;;  %s21_s30 = sadd.s32 1, %s1249_s30   ;;  %s1678_s24 = sld [smem:[#allocation8_spill]] }
 0x3ec   : > { %p1599_p5 = scmp.ge.s32.totalorder %s21_s30, 10   ;;  %s1679_s11 = sld [smem:[#allocation9_spill]] }
 0x3ed   : > { %s1680_s6 = sld [smem:[#allocation10_spill]]  ;;  %s1681_s9 = sld [smem:[#allocation11_spill]] }
 0x3ee   : > { %s1682_s13 = sld [smem:[#allocation12_spill]]  ;;  %s1684_s18 = smov %s1205_s19 }
 0x3ef   : > { %s1685_s19 = smov %s1209_s20  ;;  %s1686_s20 = smov %s1412_s29 }
 0x3f0   : > { %s1687_s21 = smov %s1217_s22  ;;  %s1688_s22 = smov %s1221_s23 }
 0x3f1   : > { %s1689_s23 = smov %s1399_s27  ;;  %s1690_s25 = smov %s1241_s28 }
 0x3f2   : > { %s1691_s26 = smov %s1679_s11  ;;  %20 = sbr.rel (!%p1599_p5) target bundleno = 12 (0xc), region = 105 }
 0x3f3   : > { %s1692_s27 = smov %s1680_s6  ;;  %s1693_s28 = smov %s1681_s9 }
 0x3f4   : > { %s1694_s29 = smov %s1682_s13 }
 0x3f9   :  { %751 = vsyncpa [#allocation3], 1 }
 0x3fa   :  { %753 = vsyncpa [#allocation3 + $0x1], 1 }
 0x3fb   :  { %754 = vsyncpa [#allocation4], 1 }
 0x3fc   :  { %756 = vsyncpa [#allocation4 + $0x1], 1 }

</bundles_post_ra>
